<compile_context>
chip_gen: v7x
topology: tpu7x:2x2x1
jax: 0.10.0
libtpu: 0.0.40
codegen_flags: <defaults>
</compile_context>

<pallas_src>
import jax
import jax.numpy as jnp
from jax import lax
from jax.experimental import pallas as pl
from jax.experimental.pallas import tpu as pltpu


LANE = 128                 # TPU lane width (last dim)
SUBLANE = 8                # f32 sublane tile
MAX_TILE_BYTES = 2 << 20   # ~2 MiB per input block (dtype-aware row count)
INNER_CHUNK_ROWS = 512     # sub-chunk of a block; bounds live vregs in the reduce
VMEM_LIMIT_BYTES = 40 << 20


def _num_grid_splits() -> int:
    """Size of the leading 'parallel' grid axis = TensorCores per chip.

    Best-effort detection; any value is functionally correct (on 1-TC chips a
    size-2 parallel axis just iterates sequentially).
    """
    try:
        kind = jax.devices()[0].device_kind.lower()
    except Exception:
        return 1
    # v7x: 2 TensorCores per chip; v4 / v5p megacore also shard 'parallel'
    # grid axes across 2 cores.
    return 2 if any(tag in kind for tag in ("v7", "v4", "v5p")) else 1


def _make_l1_kernel(tile_rows: int, chunk_rows: int, lowp_diff: bool):
    """Per-block |x - t| accumulation kernel (all statics closed over)."""
    n_chunks = tile_rows // chunk_rows
    groups = chunk_rows // SUBLANE

    def _partial_sum(x, t):
        if lowp_diff:
            # bf16/f16: packed sub/abs on the VPU, upcast only for accumulation.
            d = jnp.abs(x - t).astype(jnp.float32)
        else:
            d = jnp.abs(x.astype(jnp.float32) - t.astype(jnp.float32))
        # Pure-VPU sublane-group reduction into a vreg-shaped (8,128) partial.
        return jnp.sum(d.reshape(groups, SUBLANE, LANE), axis=0)

    def kernel(x_ref, t_ref, o_ref):
        i = pl.program_id(1)  # reduction ("arbitrary") axis

        @pl.when(i == 0)
        def _():
            o_ref[...] = jnp.zeros_like(o_ref)

        if n_chunks == 1:
            o_ref[...] += _partial_sum(x_ref[...], t_ref[...])[None]
        else:
            def body(j, acc):
                r0 = pl.multiple_of(j * chunk_rows, chunk_rows)
                return acc + _partial_sum(x_ref[pl.ds(r0, chunk_rows), :],
                                          t_ref[pl.ds(r0, chunk_rows), :])

            acc = lax.fori_loop(0, n_chunks, body,
                                jnp.zeros((SUBLANE, LANE), jnp.float32))
            o_ref[...] += acc[None]

    return kernel


def l1_loss(inp: jax.Array, target: jax.Array) -> jax.Array:
    """F.l1_loss(input, target) with default reduction='mean'."""
    # TODO(synk): PyTorch broadcasts mismatched shapes (with a warning); we
    # require matching shapes.
    assert inp.shape == target.shape, "l1_loss requires matching shapes"
    n_elem = inp.size
    if n_elem == 0:
        # PyTorch returns NaN for an empty mean reduction.
        return jnp.array(float("nan"), dtype=inp.dtype)

    x = inp.reshape(-1)
    t = target.reshape(-1)

    itemsize = jnp.dtype(inp.dtype).itemsize
    pack = max(1, 4 // itemsize)       # sublane packing factor (1 f32, 2 bf16, ...)
    sub = SUBLANE * pack               # native packed row tile (8 f32, 16 bf16)
    chunk = sub * LANE

    rem = n_elem % chunk
    if rem:
        # Rare unaligned fallback: zero-pad to a packed-sublane boundary.
        # Padding is zero in both operands, so |x - t| contributes 0.
        pad = chunk - rem
        x = jnp.pad(x, (0, pad))
        t = jnp.pad(t, (0, pad))

    rows = x.size // LANE              # multiple of `sub`
    x2 = x.reshape(rows, LANE)
    t2 = t.reshape(rows, LANE)

    # Dtype-aware block size: ~2 MiB per input block.
    max_tile_rows = MAX_TILE_BYTES // (LANE * itemsize)
    tile_rows = min(max_tile_rows, rows)
    blocks_total = rows // tile_rows   # full blocks only

    num_splits = _num_grid_splits()
    if blocks_total < num_splits:
        num_splits = 1
    blocks_per_core = blocks_total // num_splits
    blocks_main = blocks_per_core * num_splits
    rows_main = blocks_main * tile_rows

    chunk_rows = (INNER_CHUNK_ROWS
                  if tile_rows % INNER_CHUNK_ROWS == 0 else tile_rows)
    lowp_diff = inp.dtype in (jnp.bfloat16, jnp.float16)

    partial = pl.pallas_call(
        _make_l1_kernel(tile_rows, chunk_rows, lowp_diff),
        out_shape=jax.ShapeDtypeStruct((num_splits, SUBLANE, LANE), jnp.float32),
        grid_spec=pltpu.PrefetchScalarGridSpec(
            num_scalar_prefetch=0,
            grid=(num_splits, blocks_per_core),
            in_specs=[
                pl.BlockSpec((tile_rows, LANE),
                             lambda c, i: (c * blocks_per_core + i, 0)),
                pl.BlockSpec((tile_rows, LANE),
                             lambda c, i: (c * blocks_per_core + i, 0)),
            ],
            out_specs=pl.BlockSpec((1, SUBLANE, LANE), lambda c, i: (c, 0, 0)),
        ),
        compiler_params=pltpu.CompilerParams(
            dimension_semantics=("parallel", "arbitrary"),
            vmem_limit_bytes=VMEM_LIMIT_BYTES,
        ),
    )(x2, t2)

    # Single cheap cross-lane reduce in XLA.
    total = jnp.sum(partial)

    if rows_main < rows:
        # Rows not covered by full, evenly split blocks (< 2 blocks worth):
        # reduce them with plain jnp so the kernel never needs a tail mask.
        tail = jnp.abs(x2[rows_main:].astype(jnp.float32) -
                       t2[rows_main:].astype(jnp.float32))
        total = total + jnp.sum(tail)

    return (total / jnp.float32(n_elem)).astype(inp.dtype)


class L1:
    """Mirror of the PyTorch `l1` module (no parameters)."""

    def __init__(self, cfg=None, **kwargs):
        self.loss = None
        self.cfg = cfg

    def __call__(self, inp, target):
        self.loss = l1_loss(inp, target)
        return self.loss


if __name__ == "__main__":
    key = jax.random.PRNGKey(0)
    k1, k2, k3, k4, k5, k6 = jax.random.split(key, 6)

    # Primary small test (NCHW inputs, module-typical shape).
    x = jax.random.normal(k1, (2, 4, 16, 16), dtype=jnp.float32)
    y = jax.random.normal(k2, (2, 4, 16, 16), dtype=jnp.float32)
    mod = L1(cfg={})
    out = jax.block_until_ready(mod(x, y))
    ref = jnp.mean(jnp.abs(x - y))
    assert jnp.allclose(out, ref, rtol=1e-5, atol=1e-6), (out, ref)

    # Multi-block accumulation + wrapper tail path (f32).
    a = jax.random.normal(k3, (8, 1030, 128), dtype=jnp.float32)
    b = jax.random.normal(k4, (8, 1030, 128), dtype=jnp.float32)
    out2 = jax.block_until_ready(l1_loss(a, b))
    ref2 = jnp.mean(jnp.abs(a - b))
    assert jnp.allclose(out2, ref2, rtol=5e-4), (out2, ref2)

    # bf16 inputs: packed-sublane alignment + native-dtype abs-diff path.
    c = jax.random.normal(k5, (4, 2050, 128), dtype=jnp.bfloat16)
    d = jax.random.normal(k6, (4, 2050, 128), dtype=jnp.bfloat16)
    out3 = jax.block_until_ready(l1_loss(c, d))
    ref3 = jnp.mean(jnp.abs(c.astype(jnp.float32) - d.astype(jnp.float32)))
    assert jnp.allclose(out3.astype(jnp.float32), ref3, rtol=2e-2), (out3, ref3)

    print("KERNEL_OK")
</pallas_src>

<mosaic_0001>
module attributes {stable_mosaic.version = 11 : i64} {
  func.func @kernel(%arg0: i32, %arg1: i32, %arg2: memref<16x128xf32, #tpu.memory_space<vmem>>, %arg3: memref<16x128xf32, #tpu.memory_space<vmem>>, %arg4: memref<1x8x128xf32, #tpu.memory_space<vmem>>) attributes {dimension_semantics = [#tpu.dimension_semantics<parallel>, #tpu.dimension_semantics<arbitrary>], iteration_bounds = array<i64: 1, 1>, scalar_prefetch = 0 : i64, scratch_operands = 0 : i64, tpu.core_type = #tpu.core_type<tc>, window_params = [{transform_indices = @transform_0, window_bounds = array<i64: 16, 128>}, {transform_indices = @transform_1, window_bounds = array<i64: 16, 128>}, {transform_indices = @transform_2, window_bounds = array<i64: 1, 8, 128>}]} {
    %c0_i32 = arith.constant 0 : i32
    %0 = arith.cmpi eq, %arg1, %c0_i32 : i32
    %1 = arith.extui %0 : i1 to i32
    %c0_i32_0 = arith.constant 0 : i32
    %2 = arith.cmpi ne, %1, %c0_i32_0 : i32
    scf.if %2 {
      %cst_10 = arith.constant 0.000000e+00 : f32
      %13 = vector.broadcast %cst_10 : f32 to vector<1x8x128xf32>
      %c0_11 = arith.constant 0 : index
      %c0_12 = arith.constant 0 : index
      %c0_13 = arith.constant 0 : index
      %14 = vector.load %arg4[%c0_11, %c0_12, %c0_13] : memref<1x8x128xf32, #tpu.memory_space<vmem>>, vector<1x8x128xf32>
      tpu.vector_store %arg4[%c0_11, %c0_12, %c0_13], %13 {strides = array<i32>} : memref<1x8x128xf32, #tpu.memory_space<vmem>>, vector<1x8x128xf32>,
    } else {
    }
    %c0 = arith.constant 0 : index
    %c0_1 = arith.constant 0 : index
    %c0_2 = arith.constant 0 : index
    %3 = vector.load %arg4[%c0, %c0_1, %c0_2] : memref<1x8x128xf32, #tpu.memory_space<vmem>>, vector<1x8x128xf32>
    %c0_3 = arith.constant 0 : index
    %c0_4 = arith.constant 0 : index
    %4 = vector.load %arg2[%c0_3, %c0_4] : memref<16x128xf32, #tpu.memory_space<vmem>>, vector<16x128xf32>
    %c0_5 = arith.constant 0 : index
    %c0_6 = arith.constant 0 : index
    %5 = vector.load %arg3[%c0_5, %c0_6] : memref<16x128xf32, #tpu.memory_space<vmem>>, vector<16x128xf32>
    %6 = arith.subf %4, %5 : vector<16x128xf32>
    %7 = math.absf %6 : vector<16x128xf32>
    %8 = vector.shape_cast %7 : vector<16x128xf32> to vector<2x8x128xf32>
    %cst = arith.constant dense<0.000000e+00> : vector<8x128xf32>
    %9 = vector.multi_reduction <add>, %8, %cst [0] : vector<2x8x128xf32> to vector<8x128xf32>
    %10 = vector.shape_cast %9 : vector<8x128xf32> to vector<1x8x128xf32>
    %11 = arith.addf %3, %10 : vector<1x8x128xf32>
    %c0_7 = arith.constant 0 : index
    %c0_8 = arith.constant 0 : index
    %c0_9 = arith.constant 0 : index
    %12 = vector.load %arg4[%c0_7, %c0_8, %c0_9] : memref<1x8x128xf32, #tpu.memory_space<vmem>>, vector<1x8x128xf32>
    tpu.vector_store %arg4[%c0_7, %c0_8, %c0_9], %11 {strides = array<i32>} : memref<1x8x128xf32, #tpu.memory_space<vmem>>, vector<1x8x128xf32>,
    return
  }
  func.func @transform_0(%arg0: i32, %arg1: i32) -> (i32, i32) {
    %c1_i32 = arith.constant 1 : i32
    %0 = arith.muli %arg0, %c1_i32 : i32
    %1 = arith.addi %0, %arg1 : i32
    %c0_i32 = arith.constant 0 : i32
    %c0_i32_0 = arith.constant 0 : i32
    return %1, %c0_i32 : i32, i32
  }
  func.func @transform_1(%arg0: i32, %arg1: i32) -> (i32, i32) {
    %c1_i32 = arith.constant 1 : i32
    %0 = arith.muli %arg0, %c1_i32 : i32
    %1 = arith.addi %0, %arg1 : i32
    %c0_i32 = arith.constant 0 : i32
    %c0_i32_0 = arith.constant 0 : i32
    return %1, %c0_i32 : i32, i32
  }
  func.func @transform_2(%arg0: i32, %arg1: i32) -> (i32, i32, i32) {
    %c0_i32 = arith.constant 0 : i32
    %c0_i32_0 = arith.constant 0 : i32
    %c0_i32_1 = arith.constant 0 : i32
    return %arg0, %c0_i32, %c0_i32_0 : i32, i32, i32
  }
}

</mosaic_0001>

<bundles_post_ra>
// kernel: tpu_custom_call.1
= control target key start
LH: loop header
LB: loop body
LE: loop exit
PB: predicated region body
PF: predicated region fallthrough
CT: control target
= control target key end

     0   :  { %7 = vsyncpa [#allocation3], 0  ;;  %s219_s0 = inlined_call_operand.hbm [shape: f32[16,128], index: 0, kind: input, shape index: {}]   ;;  %s220_s1 = inlined_call_operand.hbm [shape: f32[16,128], index: 1, kind: input, shape index: {}]   ;;  %s221_s2 = inlined_call_operand.hbm [shape: f32[1,8,128], index: 2, kind: output, shape index: {}]  }
   0x1   :  { %8 = vsyncpa [#allocation6], 0 }
   0x2   :  { %9 = vsyncpa [#allocation4], 0  ;;  %s163_s9 = smov [#allocation2]   ;;  %s91_s13 = scalar_lea.hbm %s219_s0, 256 }
   0x3   :  { %s19_s10 = sshll.u32 %s163_s9, 4  ;;  %p92_p0 = scmp.ne.s32.totalorder %s219_s0, %s91_s13  ;;  %s20_s10 = int_to_ptr.vmem [resolvable:$true] %s19_s10 }
   0x4   :  { %p95_p1 = scmp.lt.u32.totalorder %s91_s13, %s219_s0 }
   0x6   :  { %p97_p2 = pnand %p95_p1, %p92_p0 }
   0x8   :  { %100 = shalt.err (!%p97_p2)
}
   0x9   :  { %s101_s18 = scalar_lea.vmem %s20_s10, 256  ;;  %p106_p4 = scmp.lt.s32.totalorder %s20_s10, %s20_s10 }
   0xa   :  { %p102_p3 = scmp.ne.s32.totalorder %s20_s10, %s101_s18  ;;  %p107_p5 = scmp.lt.s32.totalorder %s101_s18, %s101_s18 }
   0xc   :  { %p108_p6 = por %p107_p5, %p106_p4 }
   0xe   :  { %p109_p7 = pnand %p108_p6, %p102_p3 }
  0x10   :  { %112 = shalt.err (!%p109_p7)
}
  0x11   :  { %s164_s19 = smov 128   ;;  %s165_s20 = smov 8  }
  0x12   :  { %25 = dma.hbm_to_vmem [thread:$0]  %s219_s0, 256, %s20_s10, [#allocation3], %s164_s19, %s164_s19, %s165_s20  }
  0x13   :  { %s166_s23 = smov [#allocation5]   ;;  %s113_s27 = scalar_lea.hbm %s220_s1, 256 }
  0x14   :  { %s35_s24 = sshll.u32 %s166_s23, 4  ;;  %p114_p8 = scmp.ne.s32.totalorder %s220_s1, %s113_s27  ;;  %s36_s24 = int_to_ptr.vmem [resolvable:$true] %s35_s24 }
  0x15   :  { %p117_p9 = scmp.lt.u32.totalorder %s113_s27, %s220_s1 }
  0x17   :  { %p119_p10 = pnand %p117_p9, %p114_p8 }
  0x19   :  { %122 = shalt.err (!%p119_p10)
}
  0x1a   :  { %s123_s4 = scalar_lea.vmem %s36_s24, 256  ;;  %p128_p12 = scmp.lt.s32.totalorder %s36_s24, %s36_s24 }
  0x1b   :  { %p124_p11 = scmp.ne.s32.totalorder %s36_s24, %s123_s4  ;;  %p129_p13 = scmp.lt.s32.totalorder %s123_s4, %s123_s4 }
  0x1d   :  { %p130_p0 = por %p129_p13, %p128_p12 }
  0x1f   :  { %p131_p1 = pnand %p130_p0, %p124_p11 }
  0x21   :  { %134 = shalt.err (!%p131_p1)
}
  0x22   :  { %41 = dma.hbm_to_vmem [thread:$0]  %s220_s1, 256, %s36_s24, [#allocation6], %s164_s19, %s164_s19, %s165_s20  }
  0x23   :  { %157 = dma.done.wait [#allocation3], 256  }
  0x24   :  { %158 = vsyncadd [#allocation3], 4294967040 }
  0x25   :  { %159 = dma.done.wait [#allocation6], 256  }
  0x26   :  { %160 = vsyncadd [#allocation6], 4294967040  ;;  %v58_v0 = vld [vmem:[#allocation2] sm:$0xff]  ;;  %v59_v1 = vld [vmem:[#allocation2 + $0x8] sm:$0xff]  ;;  %s167_s6 = smov [#allocation7]  }
  0x27   :  { %v60_v2 = vld [vmem:[#allocation5] sm:$0xff]  ;;  %v61_v3 = vld [vmem:[#allocation5 + $0x8] sm:$0xff]  ;;  %s75_s7 = sshll.u32 %s167_s6, 4  ;;  %s76_s7 = int_to_ptr.vmem [resolvable:$true] %s75_s7 }
  0x28   :  { %v62_v4 = vsub.f32 %v58_v0, %v60_v2  ;;  %v63_v5 = vsub.f32 %v59_v1, %v61_v3  ;;  %s135_s8 = scalar_lea.vmem %s76_s7, 128  ;;  %p140_p3 = scmp.lt.s32.totalorder %s76_s7, %s76_s7 }
  0x29   :  { %p136_p2 = scmp.ne.s32.totalorder %s76_s7, %s135_s8  ;;  %p141_p4 = scmp.lt.s32.totalorder %s135_s8, %s135_s8 }
  0x2a   :  { %v64_v6 = vand.u32 2147483647, %v62_v4  ;;  %v65_v7 = vand.u32 2147483647, %v63_v5 }
  0x2b   :  { %p142_p5 = por %p141_p4, %p140_p3 }
  0x2c   :  { %v66_v8 = vadd.f32 %v65_v7, %v64_v6 }
  0x2d   :  { %p143_p6 = pnand %p142_p5, %p136_p2 }
  0x2e   :  { %68 = vst [vmem:[#allocation7] sm:$0xff] %v66_v8 }
  0x2f   :  { %146 = shalt.err (!%p143_p6)
}
  0x30   :  { %s147_s10 = scalar_lea.hbm %s221_s2, 128 }
  0x31   :  { %p148_p7 = scmp.ne.s32.totalorder %s221_s2, %s147_s10  ;;  %p151_p8 = scmp.lt.u32.totalorder %s147_s10, %s221_s2 }
  0x33   :  { %p153_p9 = pnand %p151_p8, %p148_p7 }
  0x35   :  { %156 = shalt.err (!%p153_p9)
}
  0x36   :  { %78 = dma.vmem_to_hbm [thread:$0]  %s76_s7, 128, %s221_s2, [#allocation4]  }
  0x37   :  { %161 = dma.done.wait [#allocation4], 128  }
  0x38   :  { %162 = vsyncadd [#allocation4], 4294967168 }
  0x39   :  { %82 = vsyncpa [#allocation3], 1 }
  0x3a   :  { %83 = vsyncpa [#allocation6], 1 }
  0x3b   :  { %84 = vsyncpa [#allocation4], 1 }

</bundles_post_ra>
